<compile_context>
chip_gen: v5e
topology: v5e:2x2
jax: 0.10.0
libtpu: 0.0.40
codegen_flags: <defaults>
</compile_context>

<pallas_src>
import jax
import jax.numpy as jnp
from jax.experimental import pallas as pl
from jax.experimental.pallas import tpu as pltpu


_LANE = 128
# Per-block byte budget; with default double buffering on input + output the
# pipeline footprint is <= 4x this (~16 MiB), safe on v5e/v6e/v7x.
_BLOCK_BUDGET_BYTES = 4 * 1024 * 1024
_VMEM_LIMIT_BYTES = 32 * 1024 * 1024


def _identity_kernel(x_ref, o_ref):
    # Pure pass-through: copy the current VMEM tile.
    o_ref[...] = x_ref[...]


def _sublane_multiple(dtype):
    itemsize = jnp.dtype(dtype).itemsize
    return max(8, 32 // max(1, itemsize))  # 8 for f32, 16 for bf16, 32 for int8


def _pick_row_tile(rows, row_bytes, sub):
    """Largest row tile that fits the VMEM budget, multiple of sublane packing."""
    tm = max(1, _BLOCK_BUDGET_BYTES // max(1, row_bytes))
    tm = max(sub, (tm // sub) * sub)
    if tm >= rows:
        tm = rows
        # If everything fits in one block, still split into >=2 blocks when
        # possible so v7x's two TensorCores both get work.
        if rows >= 2 * sub:
            tm = ((rows // 2 + sub - 1) // sub) * sub
    return tm


def _copy_2d(x2):
    rows, cols = x2.shape
    sub = _sublane_multiple(x2.dtype)
    row_bytes = cols * jnp.dtype(x2.dtype).itemsize
    tm = _pick_row_tile(rows, row_bytes, sub)
    grid_m = pl.cdiv(rows, tm)

    return pl.pallas_call(
        _identity_kernel,
        out_shape=jax.ShapeDtypeStruct((rows, cols), x2.dtype),
        grid=(grid_m,),
        in_specs=[pl.BlockSpec((tm, cols), lambda i: (i, 0))],
        out_specs=pl.BlockSpec((tm, cols), lambda i: (i, 0)),
        compiler_params=pltpu.CompilerParams(
            dimension_semantics=("parallel",),
            vmem_limit_bytes=_VMEM_LIMIT_BYTES,
        ),
    )(x2)


def identity(x):
    """Identity forward pass: returns an array equal to x (same shape/dtype)."""
    orig_shape = x.shape
    if x.size == 0:
        return x

    total = x.size
    sub = _sublane_multiple(x.dtype)

    if total % _LANE == 0:
        # Lane-dense 2D view: (rows, L) with L a multiple of 128.  Prefer an L
        # whose row count is also a multiple of the sublane packing.
        cols = None
        for cand in (2048, 1024, 512, 256, 128):
            if total % cand == 0 and (total // cand) % sub == 0:
                cols = cand
                break
        if cols is None:
            for cand in (2048, 1024, 512, 256, 128):
                if total % cand == 0:
                    cols = cand
                    break
        x2 = x.reshape(total // cols, cols)
    else:
        # Fallback for totals not divisible by 128: keep the trailing dim as
        # the lane axis (possibly narrow, but always correct).
        if x.ndim <= 1:
            x2 = x.reshape(1, total)
        else:
            x2 = x.reshape(-1, x.shape[-1])

    out = _copy_2d(x2)
    return out.reshape(orig_shape)


if __name__ == "__main__":
    key = jax.random.PRNGKey(0)
    # NCHW input consistent with a conv-style feature extractor.
    x = jax.random.normal(key, (2, 4, 16, 16), dtype=jnp.float32)

    y = identity(x)
    jax.block_until_ready(y)

    assert y.shape == x.shape
    assert y.dtype == x.dtype
    assert bool(jnp.all(y == x))

    print("KERNEL_OK")
</pallas_src>

<mosaic_0001>
module attributes {stable_mosaic.version = 11 : i64} {
  func.func @_identity_kernel(%arg0: i32, %arg1: memref<8x256xf32, #tpu.memory_space<vmem>>, %arg2: memref<8x256xf32, #tpu.memory_space<vmem>>) attributes {dimension_semantics = [#tpu.dimension_semantics<parallel>], iteration_bounds = array<i64: 1>, scalar_prefetch = 0 : i64, scratch_operands = 0 : i64, tpu.core_type = #tpu.core_type<tc>, window_params = [{transform_indices = @transform_0, window_bounds = array<i64: 8, 256>}, {transform_indices = @transform_1, window_bounds = array<i64: 8, 256>}]} {
    %c0 = arith.constant 0 : index
    %c0_0 = arith.constant 0 : index
    %0 = vector.load %arg1[%c0, %c0_0] : memref<8x256xf32, #tpu.memory_space<vmem>>, vector<8x256xf32>
    %c0_1 = arith.constant 0 : index
    %c0_2 = arith.constant 0 : index
    %1 = vector.load %arg2[%c0_1, %c0_2] : memref<8x256xf32, #tpu.memory_space<vmem>>, vector<8x256xf32>
    tpu.vector_store %arg2[%c0_1, %c0_2], %0 {strides = array<i32>} : memref<8x256xf32, #tpu.memory_space<vmem>>, vector<8x256xf32>,
    return
  }
  func.func @transform_0(%arg0: i32) -> (i32, i32) {
    %c0_i32 = arith.constant 0 : i32
    %c0_i32_0 = arith.constant 0 : i32
    return %arg0, %c0_i32 : i32, i32
  }
  func.func @transform_1(%arg0: i32) -> (i32, i32) {
    %c0_i32 = arith.constant 0 : i32
    %c0_i32_0 = arith.constant 0 : i32
    return %arg0, %c0_i32 : i32, i32
  }
}

</mosaic_0001>

<bundles_post_ra>
// kernel: tpu_custom_call.1
= control target key start
LH: loop header
LB: loop body
LE: loop exit
PB: predicated region body
PF: predicated region fallthrough
CT: control target
= control target key end

     0   :  { %6 = vsyncpa [#allocation3], 0  ;;  %s116_s0 = inlined_call_operand.hbm [shape: f32[8,256], index: 0, kind: input, shape index: {}]   ;;  %s117_s1 = inlined_call_operand.hbm [shape: f32[8,256], index: 1, kind: output, shape index: {}]  }
   0x1   :  { %7 = vsyncpa [#allocation4], 0  ;;  %s13_s8 = sshll.u32 %s116_s0, 4  ;;  %s98_s9 = smov [#allocation2]   ;;  %s14_s8 = int_to_ptr.hbm [resolvable:$true] %s13_s8 }
   0x2   :  { %s15_s10 = sshll.u32 %s98_s9, 4  ;;  %s16_s10 = int_to_ptr.vmem [resolvable:$true] %s15_s10 }
   0x3   :  { %18 = dma.hbm_to_vmem [thread:$0]  %s14_s8, 256, %s16_s10, [#allocation3]  }
   0x4   :  { %94 = dma.done.wait [#allocation3], 256  }
   0x5   :  { %95 = vsyncadd [#allocation3], 4294967040  ;;  %s99_s11 = smov [#allocation5]   ;;  %s34_s15 = sshll.u32 %s117_s1, 4  ;;  %v23_v0 = vld [vmem:[#allocation2] sm:$0xff]  ;;  %v24_v1 = vld [vmem:[#allocation2 + $0x8] sm:$0xff]  ;;  %s35_s15 = int_to_ptr.hbm [resolvable:$true] %s34_s15 }
   0x6   :  { %s32_s12 = sshll.u32 %s99_s11, 4  ;;  %25 = vst [vmem:[#allocation5] sm:$0xff] %v23_v0  ;;  %s33_s12 = int_to_ptr.vmem [resolvable:$true] %s32_s12 }
   0x7   :  { %26 = vst [vmem:[#allocation5 + $0x8] sm:$0xff] %v24_v1 }
   0x8   :  { %37 = dma.vmem_to_hbm [thread:$0]  %s33_s12, 256, %s35_s15, [#allocation4]  }
   0x9   :  { %96 = dma.done.wait [#allocation4], 256  }
   0xa   :  { %97 = vsyncadd [#allocation4], 4294967040 }
   0xb   :  { %42 = vsyncpa [#allocation3], 1 }
   0xc   :  { %43 = vsyncpa [#allocation4], 1 }

</bundles_post_ra>
